<compile_context>
chip_gen: v7x
topology: tpu7x:2x2x1
jax: 0.10.0
libtpu: 0.0.40
codegen_flags: <defaults>
</compile_context>

<pallas_src>
import functools

import jax
import jax.numpy as jnp
from jax.experimental import pallas as pl
from jax.experimental.pallas import tpu as pltpu


# ----------------------------- tile-size / folding helpers -----------------------------

def _pick_m_tile(M):
    """Fixed 8-aligned M tile used with a pl.cdiv grid.

    Partial last blocks are safe for this kernel: out-of-bounds rows only produce garbage
    accumulator rows whose stores are dropped.
    """
    for t in (256, 128, 64, 32, 16, 8):
        if M >= t:
            return t
    return M


def _pick_minor_tile(d, candidates=(256, 128)):
    """128-aligned tile for a lane/contraction dim when it divides, else the full dim."""
    for t in candidates:
        if d % t == 0:
            return t
    return d


def _fold_bn_into_weight(w, gamma, beta, mean, var, eps, mxu_dtype):
    """Fold the BN scale into the 1x1-conv weight: y = x @ w_f + bias == BN(x @ w)."""
    inv_std = 1.0 / jnp.sqrt(var.astype(jnp.float32) + eps)
    scale = gamma.astype(jnp.float32) * inv_std                      # (Cout,)
    bias = beta.astype(jnp.float32) - mean.astype(jnp.float32) * scale
    w_f = (w.astype(jnp.float32) * scale[None, :]).astype(mxu_dtype)  # (Cin, Cout)
    return w_f, bias.reshape(1, -1)


# ----------------------------- Pallas kernels -----------------------------

def _cbl_matmul_kernel(x_ref, w_ref, bias_ref, o_ref, acc_ref, *, mxu_dtype):
    """One (tm, tn) tile of y = SiLU(x @ w_folded + bias), accumulated over K tiles."""
    @pl.when(pl.program_id(2) == 0)
    def _():
        acc_ref[...] = jnp.zeros_like(acc_ref)

    acc_ref[...] += jnp.dot(x_ref[...].astype(mxu_dtype), w_ref[...],
                            preferred_element_type=jnp.float32)

    @pl.when(pl.program_id(2) == pl.num_programs(2) - 1)
    def _():
        y = acc_ref[...] + bias_ref[...]
        # SiLU epilogue stays in f32 (EUP sigmoid); cast only at the final store.
        o_ref[...] = (y * jax.nn.sigmoid(y)).astype(o_ref.dtype)


def _spp_tail_kernel(x1_ref, w0_ref, w1_ref, w2_ref, w3_ref, bias_ref,
                     o_ref, pad_ref, acc_ref, *, H, W, k0, mxu_dtype):
    """Cascaded stride-1 max-pool pyramid + concat-fused cv2 (1x1 conv + BN + SiLU).

    Grid = (Cout_tile j [parallel], channel_tile c [arbitrary]). The c axis is cv2's K
    reduction: partial MXU products accumulate into acc_ref; the bias+SiLU epilogue and
    the output store run on the last c step.
    """
    p = k0 // 2
    c_idx = pl.program_id(1)
    nblk, Hp, Wp, ct = pad_ref.shape          # (N, H + 2p, W + 2p, ct)

    @pl.when(c_idx == 0)
    def _():
        acc_ref[...] = jnp.zeros_like(acc_ref)

    # -inf halo STRIPS only (the interior is fully overwritten by every pool stage).
    # Rewritten every grid step (cheap) so the kernel stays correct when the parallel
    # axis is megacore-sharded and a core never sees grid step 0.
    pad_ref[:, 0:p, :, :] = jnp.full((nblk, p, Wp, ct), -jnp.inf, jnp.float32)
    pad_ref[:, p + H:Hp, :, :] = jnp.full((nblk, p, Wp, ct), -jnp.inf, jnp.float32)
    pad_ref[:, p:p + H, 0:p, :] = jnp.full((nblk, H, p, ct), -jnp.inf, jnp.float32)
    pad_ref[:, p:p + H, p + W:Wp, :] = jnp.full((nblk, H, p, ct), -jnp.inf, jnp.float32)

    def pool(v):
        # Separable k0 x k0 max pool, stride 1, (-inf) padding k0 // 2 — all in VMEM.
        pad_ref[:, p:p + H, p:p + W, :] = v
        xp = pad_ref[...]
        t = xp[:, 0:H, :, :]
        for dy in range(1, k0):
            t = jnp.maximum(t, xp[:, dy:dy + H, :, :])
        out = t[:, :, 0:W, :]
        for dx in range(1, k0):
            out = jnp.maximum(out, t[:, :, dx:dx + W, :])
        return out

    x1 = x1_ref[...].astype(jnp.float32)      # (N, H, W, ct)
    p1 = pool(x1)                             # == maxpool_{k0}(x1)
    p2 = pool(p1)                             # == maxpool_{2*k0-1}(x1)
    p3 = pool(p2)                             # == maxpool_{3*k0-2}(x1)

    m = nblk * H * W

    def contrib(a, w_ref):
        return jnp.dot(a.reshape(m, ct).astype(mxu_dtype), w_ref[...],
                       preferred_element_type=jnp.float32)

    acc_ref[...] = (acc_ref[...]
                    + contrib(x1, w0_ref) + contrib(p1, w1_ref)
                    + contrib(p2, w2_ref) + contrib(p3, w3_ref))

    @pl.when(c_idx == pl.num_programs(1) - 1)
    def _():
        y = acc_ref[...] + bias_ref[...]
        y = y * jax.nn.sigmoid(y)
        o_ref[...] = y.reshape(o_ref.shape).astype(o_ref.dtype)


# ----------------------------- wrappers -----------------------------

def cbl_pointwise(x_nhwc, w, gamma, beta, mean, var, eps=1e-5,
                  mxu_dtype=jnp.float32):
    """1x1 conv (bias=False) + folded BatchNorm + SiLU; NHWC in / NHWC out (tiled matmul)."""
    N, H, W, Cin = x_nhwc.shape
    Cout = w.shape[1]
    w_f, bias = _fold_bn_into_weight(w, gamma, beta, mean, var, eps, mxu_dtype)

    M = N * H * W
    x_flat = x_nhwc.reshape(M, Cin)

    tm = _pick_m_tile(M)
    tn = _pick_minor_tile(Cout, (256, 128))
    tk = _pick_minor_tile(Cin, (512, 256, 128))
    grid = (pl.cdiv(M, tm), Cout // tn, Cin // tk)

    kernel = functools.partial(_cbl_matmul_kernel, mxu_dtype=mxu_dtype)
    out_flat = pl.pallas_call(
        kernel,
        out_shape=jax.ShapeDtypeStruct((M, Cout), x_nhwc.dtype),
        grid=grid,
        in_specs=[
            pl.BlockSpec((tm, tk), lambda i, j, k: (i, k)),
            pl.BlockSpec((tk, tn), lambda i, j, k: (k, j)),
            pl.BlockSpec((1, tn), lambda i, j, k: (0, j)),
        ],
        out_specs=pl.BlockSpec((tm, tn), lambda i, j, k: (i, j)),
        scratch_shapes=[pltpu.VMEM((tm, tn), jnp.float32)],
        compiler_params=pltpu.CompilerParams(
            dimension_semantics=("parallel", "parallel", "arbitrary")),
    )(x_flat, w_f, bias)
    return out_flat.reshape(N, H, W, Cout)


def spp_tail(x1_nhwc, w, gamma, beta, mean, var, k=(5, 9, 13), eps=1e-5,
             mxu_dtype=jnp.float32):
    """Fused [maxpool pyramid + channel concat + cv2(1x1 conv+BN+SiLU)], NHWC in/out."""
    N, H, W, C = x1_nhwc.shape
    Cout = w.shape[1]
    k0 = k[0]
    # Cascade equivalence: applying pool_{k0} (stride 1, pad k0//2) i+1 times == pool_{k0+i*(k0-1)}.
    assert len(k) == 3 and k0 % 2 == 1 and \
        tuple(k) == tuple(k0 + i * (k0 - 1) for i in range(3)), k
    assert w.shape[0] == 4 * C, (w.shape, C)

    w_f, bias = _fold_bn_into_weight(w, gamma, beta, mean, var, eps, mxu_dtype)
    # Concat order in the module is [x1, pool5, pool9, pool13] along channels.
    w_slices = tuple(w_f[i * C:(i + 1) * C] for i in range(4))

    ct = _pick_minor_tile(C, (256, 128))     # cv2 K tile (channel tile of x1)
    tn = _pick_minor_tile(Cout, (256, 128))  # cv2 output-channel tile (parallel axis)
    p = k0 // 2
    grid = (Cout // tn, C // ct)             # (parallel Cout, reduction C)
    kernel = functools.partial(_spp_tail_kernel, H=H, W=W, k0=k0, mxu_dtype=mxu_dtype)

    # At production shapes (N=1, H=W<=20, ct=tn=256) the per-core footprint is ~5 MiB
    # (inputs + 4 weight tiles + halo + acc + output), well inside every chip's default
    # scoped-VMEM limit, so vmem_limit_bytes is left at the default.
    return pl.pallas_call(
        kernel,
        out_shape=jax.ShapeDtypeStruct((N, H, W, Cout), x1_nhwc.dtype),
        grid=grid,
        in_specs=[
            pl.BlockSpec((N, H, W, ct), lambda j, c: (0, 0, 0, c)),
            pl.BlockSpec((ct, tn), lambda j, c: (c, j)),
            pl.BlockSpec((ct, tn), lambda j, c: (c, j)),
            pl.BlockSpec((ct, tn), lambda j, c: (c, j)),
            pl.BlockSpec((ct, tn), lambda j, c: (c, j)),
            pl.BlockSpec((1, tn), lambda j, c: (0, j)),
        ],
        out_specs=pl.BlockSpec((N, H, W, tn), lambda j, c: (0, 0, 0, j)),
        scratch_shapes=[
            pltpu.VMEM((N, H + 2 * p, W + 2 * p, ct), jnp.float32),  # -inf halo buffer
            pltpu.VMEM((N * H * W, tn), jnp.float32),                # cv2 accumulator
        ],
        compiler_params=pltpu.CompilerParams(
            dimension_semantics=("parallel", "arbitrary")),
    )(x1_nhwc, *w_slices, bias)


def spp_forward_nhwc(x_nhwc, params, k=(5, 9, 13), mxu_dtype=jnp.float32):
    """SPP forward entirely in NHWC (two pallas_calls, no extra HBM round trips)."""
    x1 = cbl_pointwise(
        x_nhwc, params["cv1_w"], params["cv1_gamma"], params["cv1_beta"],
        params["cv1_mean"], params["cv1_var"], mxu_dtype=mxu_dtype,
    )
    return spp_tail(
        x1, params["cv2_w"], params["cv2_gamma"], params["cv2_beta"],
        params["cv2_mean"], params["cv2_var"], k=k, mxu_dtype=mxu_dtype,
    )


def spp_forward(x_nchw, params, k=(5, 9, 13), mxu_dtype=jnp.float32):
    """NCHW in -> NCHW out (PyTorch convention); transposes live only at the boundary."""
    x = jnp.transpose(x_nchw, (0, 2, 3, 1))
    y = spp_forward_nhwc(x, params, k=k, mxu_dtype=mxu_dtype)
    return jnp.transpose(y, (0, 3, 1, 2))


# ----------------------------- reference (pure JAX) -----------------------------

def _ref_cbl(x_nhwc, w, gamma, beta, mean, var, eps=1e-5):
    y = jnp.einsum("nhwc,cd->nhwd", x_nhwc, w)
    inv_std = 1.0 / jnp.sqrt(var + eps)
    y = (y - mean) * (gamma * inv_std) + beta
    return y * jax.nn.sigmoid(y)


def _ref_maxpool(x_nhwc, k):
    p = k // 2
    return jax.lax.reduce_window(
        x_nhwc, -jnp.inf, jax.lax.max,
        window_dimensions=(1, k, k, 1),
        window_strides=(1, 1, 1, 1),
        padding=((0, 0), (p, p), (p, p), (0, 0)),
    )


def spp_reference(x_nchw, params, k=(5, 9, 13)):
    x = jnp.transpose(x_nchw, (0, 2, 3, 1))
    x1 = _ref_cbl(x, params["cv1_w"], params["cv1_gamma"], params["cv1_beta"],
                  params["cv1_mean"], params["cv1_var"])
    cat = jnp.concatenate([x1] + [_ref_maxpool(x1, kk) for kk in k], axis=-1)
    y = _ref_cbl(cat, params["cv2_w"], params["cv2_gamma"], params["cv2_beta"],
                 params["cv2_mean"], params["cv2_var"])
    return jnp.transpose(y, (0, 3, 1, 2))


# ----------------------------- main -----------------------------

if __name__ == "__main__":
    # Small shapes consistent with the module.
    N, in_channels, H, W = 2, 4, 16, 16
    out_channels = 8
    c_ = in_channels // 2           # 2
    cat_channels = c_ * 4           # 8

    key = jax.random.PRNGKey(0)
    keys = jax.random.split(key, 12)

    params = {
        # cv1: Conv2d(in_channels, c_, 1, bias=False)  -> weight (Cin, Cout) for NHWC matmul
        "cv1_w": 0.1 * jax.random.normal(keys[0], (in_channels, c_), jnp.float32),
        "cv1_gamma": jax.random.uniform(keys[1], (c_,), jnp.float32, 0.5, 1.5),
        "cv1_beta": 0.1 * jax.random.normal(keys[2], (c_,), jnp.float32),
        "cv1_mean": 0.1 * jax.random.normal(keys[3], (c_,), jnp.float32),
        "cv1_var": jax.random.uniform(keys[4], (c_,), jnp.float32, 0.5, 1.5),
        # cv2: Conv2d(4*c_, out_channels, 1, bias=False)
        "cv2_w": 0.1 * jax.random.normal(keys[5], (cat_channels, out_channels), jnp.float32),
        "cv2_gamma": jax.random.uniform(keys[6], (out_channels,), jnp.float32, 0.5, 1.5),
        "cv2_beta": 0.1 * jax.random.normal(keys[7], (out_channels,), jnp.float32),
        "cv2_mean": 0.1 * jax.random.normal(keys[8], (out_channels,), jnp.float32),
        "cv2_var": jax.random.uniform(keys[9], (out_channels,), jnp.float32, 0.5, 1.5),
    }

    x = jax.random.normal(keys[10], (N, in_channels, H, W), jnp.float32)

    ref = jax.block_until_ready(spp_reference(x, params))

    # Default f32-operand path: matches the PyTorch/JAX reference to 1e-5.
    out = jax.block_until_ready(spp_forward(x, params))
    assert out.shape == (N, out_channels, H, W), out.shape
    assert jnp.allclose(out, ref, rtol=1e-5, atol=1e-5), float(jnp.max(jnp.abs(out - ref)))

    # bf16 MXU-operand fast path (~2x MXU on v6e/v7x, halved weight DMA); looser tolerance.
    out_bf16 = jax.block_until_ready(spp_forward(x, params, mxu_dtype=jnp.bfloat16))
    assert jnp.allclose(out_bf16, ref, rtol=5e-2, atol=5e-2), \
        float(jnp.max(jnp.abs(out_bf16 - ref)))

    print("KERNEL_OK")
</pallas_src>

<mosaic_0001>
module attributes {stable_mosaic.version = 11 : i64} {
  func.func @_cbl_matmul_kernel(%arg0: i32, %arg1: i32, %arg2: i32, %arg3: memref<256x4xf32, #tpu.memory_space<vmem>>, %arg4: memref<4x2xf32, #tpu.memory_space<vmem>>, %arg5: memref<1x2xf32, #tpu.memory_space<vmem>>, %arg6: memref<256x2xf32, #tpu.memory_space<vmem>>, %arg7: memref<256x2xf32, #tpu.memory_space<vmem>>) attributes {dimension_semantics = [#tpu.dimension_semantics<parallel>, #tpu.dimension_semantics<parallel>, #tpu.dimension_semantics<arbitrary>], iteration_bounds = array<i64: 2, 1, 1>, scalar_prefetch = 0 : i64, scratch_operands = 1 : i64, tpu.core_type = #tpu.core_type<tc>, window_params = [{transform_indices = @transform_0, window_bounds = array<i64: 256, 4>}, {transform_indices = @transform_1, window_bounds = array<i64: 4, 2>}, {transform_indices = @transform_2, window_bounds = array<i64: 1, 2>}, {transform_indices = @transform_3, window_bounds = array<i64: 256, 2>}]} {
    %c0_i32 = arith.constant 0 : i32
    %0 = arith.cmpi eq, %arg2, %c0_i32 : i32
    %1 = arith.extui %0 : i1 to i32
    %c0_i32_0 = arith.constant 0 : i32
    %2 = arith.cmpi ne, %1, %c0_i32_0 : i32
    scf.if %2 {
      %cst_10 = arith.constant 0.000000e+00 : f32
      %12 = vector.broadcast %cst_10 : f32 to vector<256x2xf32>
      %c0_11 = arith.constant 0 : index
      %c0_12 = arith.constant 0 : index
      %13 = vector.load %arg7[%c0_11, %c0_12] : memref<256x2xf32, #tpu.memory_space<vmem>>, vector<256x2xf32>
      tpu.vector_store %arg7[%c0_11, %c0_12], %12 {strides = array<i32>} : memref<256x2xf32, #tpu.memory_space<vmem>>, vector<256x2xf32>,
    } else {
    }
    %c0 = arith.constant 0 : index
    %c0_1 = arith.constant 0 : index
    %3 = vector.load %arg7[%c0, %c0_1] : memref<256x2xf32, #tpu.memory_space<vmem>>, vector<256x2xf32>
    %c0_2 = arith.constant 0 : index
    %c0_3 = arith.constant 0 : index
    %4 = vector.load %arg3[%c0_2, %c0_3] : memref<256x4xf32, #tpu.memory_space<vmem>>, vector<256x4xf32>
    %c0_4 = arith.constant 0 : index
    %c0_5 = arith.constant 0 : index
    %5 = vector.load %arg4[%c0_4, %c0_5] : memref<4x2xf32, #tpu.memory_space<vmem>>, vector<4x2xf32>
    %cst = arith.constant dense<0.000000e+00> : vector<256x2xf32>
    %6 = tpu.matmul %4, %5, %cst {dimension_numbers = #tpu.dot_dimension_numbers<[1], [0], [0], [1], [0, 0, 1, 1], [], []>} : vector<256x4xf32>, vector<4x2xf32>, vector<256x2xf32> -> vector<256x2xf32>
    %7 = arith.addf %3, %6 : vector<256x2xf32>
    %c0_6 = arith.constant 0 : index
    %c0_7 = arith.constant 0 : index
    %8 = vector.load %arg7[%c0_6, %c0_7] : memref<256x2xf32, #tpu.memory_space<vmem>>, vector<256x2xf32>
    tpu.vector_store %arg7[%c0_6, %c0_7], %7 {strides = array<i32>} : memref<256x2xf32, #tpu.memory_space<vmem>>, vector<256x2xf32>,
    %c0_i32_8 = arith.constant 0 : i32
    %9 = arith.cmpi eq, %arg2, %c0_i32_8 : i32
    %10 = arith.extui %9 : i1 to i32
    %c0_i32_9 = arith.constant 0 : i32
    %11 = arith.cmpi ne, %10, %c0_i32_9 : i32
    scf.if %11 {
      %c0_10 = arith.constant 0 : index
      %c0_11 = arith.constant 0 : index
      %12 = vector.load %arg7[%c0_10, %c0_11] : memref<256x2xf32, #tpu.memory_space<vmem>>, vector<256x2xf32>
      %c0_12 = arith.constant 0 : index
      %c0_13 = arith.constant 0 : index
      %13 = vector.load %arg5[%c0_12, %c0_13] : memref<1x2xf32, #tpu.memory_space<vmem>>, vector<1x2xf32>
      %14 = vector.broadcast %13 : vector<1x2xf32> to vector<256x2xf32>
      %15 = arith.addf %12, %14 : vector<256x2xf32>
      %16 = arith.negf %15 : vector<256x2xf32>
      %17 = math.exp %16 : vector<256x2xf32>
      %cst_14 = arith.constant 1.000000e+00 : f32
      %18 = vector.broadcast %cst_14 : f32 to vector<256x2xf32>
      %19 = arith.addf %18, %17 : vector<256x2xf32>
      %20 = arith.divf %18, %19 : vector<256x2xf32>
      %21 = arith.mulf %15, %20 : vector<256x2xf32>
      %c0_15 = arith.constant 0 : index
      %c0_16 = arith.constant 0 : index
      %22 = vector.load %arg6[%c0_15, %c0_16] : memref<256x2xf32, #tpu.memory_space<vmem>>, vector<256x2xf32>
      tpu.vector_store %arg6[%c0_15, %c0_16], %21 {strides = array<i32>} : memref<256x2xf32, #tpu.memory_space<vmem>>, vector<256x2xf32>,
    } else {
    }
    return
  }
  func.func @transform_0(%arg0: i32, %arg1: i32, %arg2: i32) -> (i32, i32) {
    %c0_i32 = arith.constant 0 : i32
    return %arg0, %arg2 : i32, i32
  }
  func.func @transform_1(%arg0: i32, %arg1: i32, %arg2: i32) -> (i32, i32) {
    %c0_i32 = arith.constant 0 : i32
    return %arg2, %arg1 : i32, i32
  }
  func.func @transform_2(%arg0: i32, %arg1: i32, %arg2: i32) -> (i32, i32) {
    %c0_i32 = arith.constant 0 : i32
    %c0_i32_0 = arith.constant 0 : i32
    return %c0_i32, %arg1 : i32, i32
  }
  func.func @transform_3(%arg0: i32, %arg1: i32, %arg2: i32) -> (i32, i32) {
    %c0_i32 = arith.constant 0 : i32
    return %arg0, %arg1 : i32, i32
  }
}

</mosaic_0001>

<bundles_post_ra>
// kernel: tpu_custom_call.1
= control target key start
LH: loop header
LB: loop body
LE: loop exit
PB: predicated region body
PF: predicated region fallthrough
CT: control target
= control target key end

     0   :  { %s1550_s12 = smov 0   ;;  %s1552_s13 = smov 0   ;;  %s1976_s0 = inlined_call_operand.vmem [shape: f32[512,4], index: 0, kind: input, shape index: {}]   ;;  %s1977_s1 = inlined_call_operand.vmem [shape: f32[4,2], index: 1, kind: input, shape index: {}]   ;;  %s1978_s2 = inlined_call_operand.vmem [shape: f32[1,2], index: 2, kind: input, shape index: {}]   ;;  %s1979_s3 = inlined_call_operand.vmem [shape: f32[512,2], index: 3, kind: output, shape index: {}]  }
   0x1   :  { %s1554_s14 = smov 0  }
   0x2 LB: > { %s32_s15 = sadd.s32 1, %s1523_s13  ;;  %p1194_p0 = scmp.ge.s32.totalorder %s1527_s14, 1  ;;  %s1527_s14 = sphi %s1554_s14, %s13_s14   ;;  %s1523_s13 = sphi %s1552_s13, %s1982_s13   ;;  %s1519_s12 = sphi %s1550_s12, %s1981_s12  }
   0x3   : > { %p34_p1 = scmp.ge.s32.totalorder %s32_s15, 2  ;;  %p186_p2 = scmp.lt.s32.totalorder %s1527_s14, 3 }
   0x5   : > { %s1984_s15 = smov (%p34_p1, %s32_s15), 0  ;;  %p187_p3 = pnand %p1194_p0, %p186_p2 }
   0x6   : > { %v355_v0 = vld [vmem:[%s1977_s1] sm:$0xf] (!%p187_p3)  ;;  %vm453_vm0 = vcmask (!%p187_p3), 1043456   ;;  %s1195_s18 = sshll.u32 (!%p187_p3), %s1519_s12, 5  ;;  %vm258_vm1 = vcmask (!%p187_p3), 15360   ;;  %v1529_v1 = vmov (!%p187_p3), 0.0  }
   0x7   : > { %190 = sbr.rel (%p187_p3) target bundleno = 330 (0x14a), region = 32  ;;  %1300 = vmatprep.subr.msk.mxu0 (!%p187_p3), %vm453_vm0, %v355_v0  ;;  %1350 = vmatprep.subr.msk.mxu1 (!%p187_p3), %vm453_vm0, %v355_v0  ;;  %p1576_p4 = scmp.lt.s32.totalorder (!%p187_p3), %s1195_s18, 63  ;;  %260 = vst.msk [vmem:[#allocation2 + $0x8] sm:$0xff] (!%p187_p3), %vm258_vm1, %v1529_v1  ;;  %259 = vst.msk [vmem:[#allocation2] sm:$0xff] (!%p187_p3), %vm258_vm1, %v1529_v1  ;;  %vm356_vm2 = vcmask (!%p187_p3), 31744  }
   0x8   : > { %1301 = vmatpush3.msk.msra.mxu0 (!%p187_p3), %vm453_vm0, %v355_v0  ;;  %1351 = vmatpush3.msk.msra.mxu1 (!%p187_p3), %vm453_vm0, %v355_v0  ;;  %261 = vst.msk [vmem:[#allocation2 + $0x10] sm:$0xff] (!%p187_p3), %vm258_vm1, %v1529_v1  ;;  %262 = vst.msk [vmem:[#allocation2 + $0x18] sm:$0xff] (!%p187_p3), %vm258_vm1, %v1529_v1  ;;  %v1699_v62 = vld [vmem:[%s1978_s2] ss:$0 sm:$0xff] (!%p187_p3) }
   0x9   : > { %263 = vst.msk [vmem:[#allocation2 + $0x20] sm:$0xff] (!%p187_p3), %vm258_vm1, %v1529_v1  ;;  %264 = vst.msk [vmem:[#allocation2 + $0x28] sm:$0xff] (!%p187_p3), %vm258_vm1, %v1529_v1 }
   0xa   : > { %265 = vst.msk [vmem:[#allocation2 + $0x30] sm:$0xff] (!%p187_p3), %vm258_vm1, %v1529_v1  ;;  %266 = vst.msk [vmem:[#allocation2 + $0x38] sm:$0xff] (!%p187_p3), %vm258_vm1, %v1529_v1 }
   0xb   : > { %267 = vst.msk [vmem:[#allocation2 + $0x40] sm:$0xff] (!%p187_p3), %vm258_vm1, %v1529_v1  ;;  %268 = vst.msk [vmem:[#allocation2 + $0x48] sm:$0xff] (!%p187_p3), %vm258_vm1, %v1529_v1 }
   0xc   : > { %269 = vst.msk [vmem:[#allocation2 + $0x50] sm:$0xff] (!%p187_p3), %vm258_vm1, %v1529_v1  ;;  %270 = vst.msk [vmem:[#allocation2 + $0x58] sm:$0xff] (!%p187_p3), %vm258_vm1, %v1529_v1 }
   0xd   : > { %271 = vst.msk [vmem:[#allocation2 + $0x60] sm:$0xff] (!%p187_p3), %vm258_vm1, %v1529_v1  ;;  %272 = vst.msk [vmem:[#allocation2 + $0x68] sm:$0xff] (!%p187_p3), %vm258_vm1, %v1529_v1 }
   0xe   : > { %273 = vst.msk [vmem:[#allocation2 + $0x70] sm:$0xff] %vm258_vm1, %v1529_v1  ;;  %274 = vst.msk [vmem:[#allocation2 + $0x78] sm:$0xff] %vm258_vm1, %v1529_v1  ;;  %s1986_s18 = smov (!%p1576_p4, %s1195_s18), 63  ;;  %v292_v34 = vld [vmem:[#allocation2 + $0x8] sm:$0xff]  ;;  %v291_v36 = vld [vmem:[#allocation2] sm:$0xff] }
   0xf   : > { %275 = vst.msk [vmem:[#allocation2 + $0x80] sm:$0xff] %vm258_vm1, %v1529_v1  ;;  %276 = vst.msk [vmem:[#allocation2 + $0x88] sm:$0xff] %vm258_vm1, %v1529_v1  ;;  %s1196_s20 = sshll.u32 %s1986_s18, 3  ;;  %v294_v46 = vld [vmem:[#allocation2 + $0x18] sm:$0xff]  ;;  %v293_v48 = vld [vmem:[#allocation2 + $0x10] sm:$0xff] }
  0x10   : > { %277 = vst.msk [vmem:[#allocation2 + $0x90] sm:$0xff] %vm258_vm1, %v1529_v1  ;;  %278 = vst.msk [vmem:[#allocation2 + $0x98] sm:$0xff] %vm258_vm1, %v1529_v1  ;;  %s1624_s23 = scalar_lea.vmem %s1976_s0, %s1196_s20  ;;  %v296_v58 = vld [vmem:[#allocation2 + $0x28] sm:$0xff]  ;;  %v295_v60 = vld [vmem:[#allocation2 + $0x20] sm:$0xff]  ;;  %s1807_s28 = scalar_lea.vmem %s1979_s3, %s1196_s20 }
  0x11   : > { %279 = vst.msk [vmem:[#allocation2 + $0xa0] sm:$0xff] %vm258_vm1, %v1529_v1  ;;  %280 = vst.msk [vmem:[#allocation2 + $0xa8] sm:$0xff] %vm258_vm1, %v1529_v1  ;;  %v323_v2 = vld [vmem:[%s1624_s23] sm:$0xff]  ;;  %v324_v4 = vld [vmem:[%s1624_s23 + $0x8] sm:$0xff] }
  0x12   : > { %281 = vst.msk [vmem:[#allocation2 + $0xb0] sm:$0xff] %vm258_vm1, %v1529_v1  ;;  %282 = vst.msk [vmem:[#allocation2 + $0xb8] sm:$0xff] %vm258_vm1, %v1529_v1  ;;  %v339_v3 = vld [vmem:[%s1624_s23 + $0x80] sm:$0xff]  ;;  %1302 = vmatprep.mubr.msk.f32.mxu0 %vm356_vm2, %v323_v2  ;;  %v340_v5 = vld [vmem:[%s1624_s23 + $0x88] sm:$0xff] }
  0x13   : > { %283 = vst.msk [vmem:[#allocation2 + $0xc0] sm:$0xff] %vm258_vm1, %v1529_v1  ;;  %284 = vst.msk [vmem:[#allocation2 + $0xc8] sm:$0xff] %vm258_vm1, %v1529_v1  ;;  %1326 = vmatprep.mubr.msk.f32.mxu1 %vm356_vm2, %v339_v3  ;;  %v325_v6 = vld [vmem:[%s1624_s23 + $0x10] sm:$0xff]  ;;  %1303 = vmatmul.mubr.msk.f32.vlgmr.msra.gmra.mrb[0].mxu0 %vm356_vm2, %v324_v4  ;;  %v326_v8 = vld [vmem:[%s1624_s23 + $0x18] sm:$0xff] }
  0x14   : > { %285 = vst.msk [vmem:[#allocation2 + $0xd0] sm:$0xff] %vm258_vm1, %v1529_v1  ;;  %286 = vst.msk [vmem:[#allocation2 + $0xd8] sm:$0xff] %vm258_vm1, %v1529_v1  ;;  %v341_v7 = vld [vmem:[%s1624_s23 + $0x90] sm:$0xff]  ;;  %1327 = vmatmul.mubr.msk.f32.vlgmr.msra.gmra.mrb[0].mxu1 %vm356_vm2, %v340_v5  ;;  %1305 = vmatprep.mubr.msk.f32.mxu0 %vm356_vm2, %v325_v6  ;;  %v342_v9 = vld [vmem:[%s1624_s23 + $0x98] sm:$0xff] }
  0x15   : > { %287 = vst.msk [vmem:[#allocation2 + $0xe0] sm:$0xff] %vm258_vm1, %v1529_v1  ;;  %288 = vst.msk [vmem:[#allocation2 + $0xe8] sm:$0xff] %vm258_vm1, %v1529_v1  ;;  %1329 = vmatprep.mubr.msk.f32.mxu1 %vm356_vm2, %v341_v7  ;;  %v327_v10 = vld [vmem:[%s1624_s23 + $0x20] sm:$0xff]  ;;  %v328_v12 = vld [vmem:[%s1624_s23 + $0x28] sm:$0xff] }
  0x16   : > { %289 = vst.msk [vmem:[#allocation2 + $0xf0] sm:$0xff] %vm258_vm1, %v1529_v1  ;;  %290 = vst.msk [vmem:[#allocation2 + $0xf8] sm:$0xff] %vm258_vm1, %v1529_v1  ;;  %v343_v11 = vld [vmem:[%s1624_s23 + $0xa0] sm:$0xff]  ;;  %v344_v13 = vld [vmem:[%s1624_s23 + $0xa8] sm:$0xff] }
  0x17   : > { %1306 = vmatmul.mubr.msk.f32.gmra.mrb[2].mxu0 %vm356_vm2, %v326_v8  ;;  %v329_v14 = vld [vmem:[%s1624_s23 + $0x30] sm:$0xff]  ;;  %v330_v16 = vld [vmem:[%s1624_s23 + $0x38] sm:$0xff]  ;;  %v331_v18 = vld [vmem:[%s1624_s23 + $0x40] sm:$0xff] }
  0x18   : > { %1330 = vmatmul.mubr.msk.f32.gmra.mrb[2].mxu1 %vm356_vm2, %v342_v9  ;;  %1308 = vmatprep.mubr.msk.f32.mxu0 %vm356_vm2, %v327_v10  ;;  %v345_v15 = vld [vmem:[%s1624_s23 + $0xb0] sm:$0xff]  ;;  %v346_v17 = vld [vmem:[%s1624_s23 + $0xb8] sm:$0xff]  ;;  %v347_v19 = vld [vmem:[%s1624_s23 + $0xc0] sm:$0xff] }
  0x19   : > { %1332 = vmatprep.mubr.msk.f32.mxu1 %vm356_vm2, %v343_v11  ;;  %v332_v20 = vld [vmem:[%s1624_s23 + $0x48] sm:$0xff]  ;;  %v333_v22 = vld [vmem:[%s1624_s23 + $0x50] sm:$0xff]  ;;  %v334_v24 = vld [vmem:[%s1624_s23 + $0x58] sm:$0xff] }
  0x1a   : > { %v348_v21 = vld [vmem:[%s1624_s23 + $0xc8] sm:$0xff]  ;;  %v349_v23 = vld [vmem:[%s1624_s23 + $0xd0] sm:$0xff]  ;;  %v350_v25 = vld [vmem:[%s1624_s23 + $0xd8] sm:$0xff] }
  0x1b   : > { %1309 = vmatmul.mubr.msk.f32.gmra.mrb[4].mxu0 %vm356_vm2, %v328_v12  ;;  %v335_v26 = vld [vmem:[%s1624_s23 + $0x60] sm:$0xff]  ;;  %v336_v28 = vld [vmem:[%s1624_s23 + $0x68] sm:$0xff]  ;;  %v337_v30 = vld [vmem:[%s1624_s23 + $0x70] sm:$0xff] }
  0x1c   : > { %1333 = vmatmul.mubr.msk.f32.gmra.mrb[4].mxu1 %vm356_vm2, %v344_v13  ;;  %1311 = vmatprep.mubr.msk.f32.mxu0 %vm356_vm2, %v329_v14  ;;  %v351_v27 = vld [vmem:[%s1624_s23 + $0xe0] sm:$0xff]  ;;  %v352_v29 = vld [vmem:[%s1624_s23 + $0xe8] sm:$0xff]  ;;  %v353_v31 = vld [vmem:[%s1624_s23 + $0xf0] sm:$0xff] }
  0x1d   : > { %1335 = vmatprep.mubr.msk.f32.mxu1 %vm356_vm2, %v345_v15  ;;  %v338_v32 = vld [vmem:[%s1624_s23 + $0x78] sm:$0xff]  ;;  %v308_v35 = vld [vmem:[#allocation2 + $0x88] sm:$0xff]  ;;  %v307_v37 = vld [vmem:[#allocation2 + $0x80] sm:$0xff] }
  0x1e   : > { %v354_v33 = vld [vmem:[%s1624_s23 + $0xf8] sm:$0xff]  ;;  %v309_v49 = vld [vmem:[#allocation2 + $0x90] sm:$0xff]  ;;  %v312_v59 = vld [vmem:[#allocation2 + $0xa8] sm:$0xff] }
  0x1f   : > { %1312 = vmatmul.mubr.msk.f32.gmra.mrb[6].mxu0 %vm356_vm2, %v330_v16  ;;  %v310_v47 = vld [vmem:[#allocation2 + $0x98] sm:$0xff]  ;;  %v311_v61 = vld [vmem:[#allocation2 + $0xa0] sm:$0xff]  ;;  %v297_v11 = vld [vmem:[#allocation2 + $0x30] sm:$0xff] }
  0x20   : > { %1336 = vmatmul.mubr.msk.f32.gmra.mrb[6].mxu1 %vm356_vm2, %v346_v17  ;;  %1314 = vmatprep.mubr.msk.f32.mxu0 %vm356_vm2, %v331_v18  ;;  %v298_v5 = vld [vmem:[#allocation2 + $0x38] sm:$0xff]  ;;  %v313_v16 = vld [vmem:[#allocation2 + $0xb0] sm:$0xff] }
  0x21   : > { %1338 = vmatprep.mubr.msk.f32.mxu1 %vm356_vm2, %v347_v19  ;;  %v314_v6 = vld [vmem:[#allocation2 + $0xb8] sm:$0xff] }
  0x23   : > { %1315 = vmatmul.mubr.msk.f32.gmra.mrb[8].mxu0 %vm356_vm2, %v332_v20 }
  0x24   : > { %1339 = vmatmul.mubr.msk.f32.gmra.mrb[8].mxu1 %vm356_vm2, %v348_v21  ;;  %1317 = vmatprep.mubr.msk.f32.mxu0 %vm356_vm2, %v333_v22  ;;  %v300_v21 = vld [vmem:[#allocation2 + $0x48] sm:$0xff] }
  0x25   : > { %1341 = vmatprep.mubr.msk.f32.mxu1 %vm356_vm2, %v349_v23 }
  0x27   : > { %1318 = vmatmul.mubr.msk.f32.gmra.mrb[10].mxu0 %vm356_vm2, %v334_v24 }
  0x28   : > { %1342 = vmatmul.mubr.msk.f32.gmra.mrb[10].mxu1 %vm356_vm2, %v350_v25  ;;  %1320 = vmatprep.mubr.msk.f32.mxu0 %vm356_vm2, %v335_v26 }
  0x29   : > { %1344 = vmatprep.mubr.msk.f32.mxu1 %vm356_vm2, %v351_v27 }
  0x2b   : > { %1321 = vmatmul.mubr.msk.f32.gmra.mrb[12].mxu0 %vm356_vm2, %v336_v28 }
  0x2c   : > { %1345 = vmatmul.mubr.msk.f32.gmra.mrb[12].mxu1 %vm356_vm2, %v352_v29  ;;  %1323 = vmatprep.mubr.msk.f32.mxu0 %vm356_vm2, %v337_v30 }
  0x2d   : > { %1347 = vmatprep.mubr.msk.f32.mxu1 %vm356_vm2, %v353_v31 }
  0x2f   : > { %1324 = vmatmul.mubr.msk.f32.gmra.mrb[14].mxu0 %vm356_vm2, %v338_v32 }
  0x30   : > { %1348 = vmatmul.mubr.msk.f32.gmra.mrb[14].mxu1 %vm356_vm2, %v354_v33 }
  0xe6   : > { %v1304_v38 = vpop.f32.mrb[0].mxu0 }
  0xe7   : > { %v1328_v39 = vpop.f32.mrb[0].mxu1  ;;  %v683_v40 = vadd.f32 %v1304_v38, %v292_v34  ;;  %v523_v42 = vpop.f32.mrb[1].mxu0  ;;  %v316_v38 = vld [vmem:[#allocation2 + $0xc8] sm:$0xff] }
  0xe8   : > { %v699_v41 = vadd.f32 %v1328_v39, %v308_v35  ;;  %v603_v43 = vpop.f32.mrb[1].mxu1  ;;  %v682_v44 = vadd.f32 %v523_v42, %v291_v36 }
  0xe9   : > { %v698_v45 = vadd.f32 %v603_v43, %v307_v37  ;;  %716 = vst.msk [vmem:[#allocation2 + $0x8] sm:$0xff] %vm258_vm1, %v683_v40  ;;  %v299_v43 = vld [vmem:[#allocation2 + $0x40] sm:$0xff] }
  0xea   : > { %732 = vst.msk [vmem:[#allocation2 + $0x88] sm:$0xff] %vm258_vm1, %v699_v41  ;;  %715 = vst.msk [vmem:[#allocation2] sm:$0xff] %vm258_vm1, %v682_v44  ;;  %v1307_v50 = vpop.f32.mrb[2].mxu0  ;;  %v315_v44 = vld [vmem:[#allocation2 + $0xc0] sm:$0xff] }
  0xeb   : > { %731 = vst.msk [vmem:[#allocation2 + $0x80] sm:$0xff] %vm258_vm1, %v698_v45  ;;  %v1331_v51 = vpop.f32.mrb[2].mxu1  ;;  %v685_v52 = vadd.f32 %v1307_v50, %v294_v46  ;;  %v533_v54 = vpop.f32.mrb[3].mxu0  ;;  %v302_v45 = vld [vmem:[#allocation2 + $0x58] sm:$0xff] }
  0xec   : > { %v701_v53 = vadd.f32 %v1331_v51, %v310_v47  ;;  %v613_v55 = vpop.f32.mrb[3].mxu1  ;;  %v684_v56 = vadd.f32 %v533_v54, %v293_v48 }
  0xed   : > { %v700_v57 = vadd.f32 %v613_v55, %v309_v49  ;;  %718 = vst.msk [vmem:[#allocation2 + $0x18] sm:$0xff] %vm258_vm1, %v685_v52 }
  0xee   : > { %734 = vst.msk [vmem:[#allocation2 + $0x98] sm:$0xff] %vm258_vm1, %v701_v53  ;;  %717 = vst.msk [vmem:[#allocation2 + $0x10] sm:$0xff] %vm258_vm1, %v684_v56  ;;  %v1310_v63 = vpop.f32.mrb[4].mxu0 }
  0xef   : > { %733 = vst.msk [vmem:[#allocation2 + $0x90] sm:$0xff] %vm258_vm1, %v700_v57  ;;  %v1334_v0 = vpop.f32.mrb[4].mxu1  ;;  %v687_v1 = vadd.f32 %v1310_v63, %v296_v58  ;;  %v543_v3 = vpop.f32.mrb[5].mxu0 }
  0xf0   : > { %v703_v2 = vadd.f32 %v1334_v0, %v312_v59  ;;  %v623_v4 = vpop.f32.mrb[5].mxu1  ;;  %v751_v7 = vld [vmem:[#allocation2 + $0x8] sm:$0xff]  ;;  %v686_v9 = vadd.f32 %v543_v3, %v295_v60 }
  0xf1   : > { %v767_v8 = vld [vmem:[#allocation2 + $0x88] sm:$0xff]  ;;  %v702_v10 = vadd.f32 %v623_v4, %v311_v61  ;;  %v1704_v12 = vadd.f32 %v1699_v62, %v751_v7  ;;  %v750_v14 = vld [vmem:[#allocation2] sm:$0xff]  ;;  %720 = vst.msk [vmem:[#allocation2 + $0x28] sm:$0xff] %vm258_vm1, %v687_v1  ;;  %v318_v61 = vld [vmem:[#allocation2 + $0xd8] sm:$0xff] }
  0xf2   : > { %v1707_v13 = vadd.f32 %v1699_v62, %v767_v8  ;;  %v766_v15 = vld [vmem:[#allocation2 + $0x80] sm:$0xff]  ;;  %736 = vst.msk [vmem:[#allocation2 + $0xa8] sm:$0xff] %vm258_vm1, %v703_v2  ;;  %v1712_v17 = vadd.f32 %v1699_v62, %v750_v14  ;;  %719 = vst.msk [vmem:[#allocation2 + $0x20] sm:$0xff] %vm258_vm1, %v686_v9  ;;  %v1313_v19 = vpop.f32.mrb[6].mxu0  ;;  %v301_v4 = vld [vmem:[#allocation2 + $0x50] sm:$0xff] }
  0xf3   : > { %v1715_v18 = vadd.f32 %v1699_v62, %v766_v15  ;;  %735 = vst.msk [vmem:[#allocation2 + $0xa0] sm:$0xff] %vm258_vm1, %v702_v10  ;;  %v1337_v20 = vpop.f32.mrb[6].mxu1  ;;  %v1234_v22 = vmul.f32 -1.442695, %v1704_v12  ;;  %v689_v24 = vadd.f32 %v1313_v19, %v298_v5  ;;  %v553_v26 = vpop.f32.mrb[7].mxu0  ;;  %v317_v5 = vld [vmem:[#allocation2 + $0xd0] sm:$0xff] }
  0xf4   : > { %v1250_v23 = vmul.f32 -1.442695, %v1707_v13  ;;  %v705_v25 = vadd.f32 %v1337_v20, %v314_v6  ;;  %v633_v27 = vpop.f32.mrb[7].mxu1  ;;  %v1233_v28 = vmul.f32 -1.442695, %v1712_v17  ;;  %v753_v30 = vld [vmem:[#allocation2 + $0x18] sm:$0xff]  ;;  %v688_v32 = vadd.f32 %v553_v26, %v297_v11 }
  0xf5   : > { %v1249_v29 = vmul.f32 -1.442695, %v1715_v18  ;;  %v769_v31 = vld [vmem:[#allocation2 + $0x98] sm:$0xff]  ;;  %v704_v33 = vadd.f32 %v633_v27, %v313_v16  ;;  %1377 = vpow2.f32 %v1234_v22  ;;  %v1724_v34 = vadd.f32 %v1699_v62, %v753_v30  ;;  %v752_v36 = vld [vmem:[#allocation2 + $0x10] sm:$0xff]  ;;  %722 = vst.msk [vmem:[#allocation2 + $0x38] sm:$0xff] %vm258_vm1, %v689_v24  ;;  %v304_v19 = vld [vmem:[#allocation2 + $0x68] sm:$0xff] }
  0xf6   : > { %v1727_v35 = vadd.f32 %v1699_v62, %v769_v31  ;;  %v768_v37 = vld [vmem:[#allocation2 + $0x90] sm:$0xff]  ;;  %738 = vst.msk [vmem:[#allocation2 + $0xb8] sm:$0xff] %vm258_vm1, %v705_v25  ;;  %1379 = vpow2.f32 %v1250_v23  ;;  %v1732_v39 = vadd.f32 %v1699_v62, %v752_v36  ;;  %721 = vst.msk [vmem:[#allocation2 + $0x30] sm:$0xff] %vm258_vm1, %v688_v32  ;;  %v1316_v41 = vpop.f32.mrb[8].mxu0  ;;  %v320_v24 = vld [vmem:[#allocation2 + $0xe8] sm:$0xff] }
  0xf7   : > { %v1735_v40 = vadd.f32 %v1699_v62, %v768_v37  ;;  %737 = vst.msk [vmem:[#allocation2 + $0xb0] sm:$0xff] %vm258_vm1, %v704_v33  ;;  %v1340_v42 = vpop.f32.mrb[8].mxu1  ;;  %1381 = vpow2.f32 %v1233_v28  ;;  %v1236_v46 = vmul.f32 -1.442695, %v1724_v34  ;;  %v691_v48 = vadd.f32 %v1316_v41, %v300_v21  ;;  %v563_v49 = vpop.f32.mrb[9].mxu0 }
  0xf8   : > { %v1252_v47 = vmul.f32 -1.442695, %v1727_v35  ;;  %v643_v50 = vpop.f32.mrb[9].mxu1  ;;  %1383 = vpow2.f32 %v1249_v29  ;;  %v1235_v51 = vmul.f32 -1.442695, %v1732_v39  ;;  %v755_v53 = vld [vmem:[#allocation2 + $0x28] sm:$0xff]  ;;  %v707_v55 = vadd.f32 %v1340_v42, %v316_v38 }
  0xf9   : > { %v1251_v52 = vmul.f32 -1.442695, %v1735_v40  ;;  %v771_v54 = vld [vmem:[#allocation2 + $0xa8] sm:$0xff]  ;;  %1385 = vpow2.f32 %v1236_v46  ;;  %v1744_v56 = vadd.f32 %v1699_v62, %v755_v53  ;;  %v754_v58 = vld [vmem:[#allocation2 + $0x20] sm:$0xff]  ;;  %724 = vst.msk [vmem:[#allocation2 + $0x48] sm:$0xff] %vm258_vm1, %v691_v48  ;;  %v690_v60 = vadd.f32 %v563_v49, %v299_v43 }
  0xfa   : > { %v1747_v57 = vadd.f32 %v1699_v62, %v771_v54  ;;  %v770_v59 = vld [vmem:[#allocation2 + $0xa0] sm:$0xff]  ;;  %1387 = vpow2.f32 %v1252_v47  ;;  %v1751_v63 = vadd.f32 %v1699_v62, %v754_v58  ;;  %740 = vst.msk [vmem:[#allocation2 + $0xc8] sm:$0xff] %vm258_vm1, %v707_v55  ;;  %v706_v1 = vadd.f32 %v643_v50, %v315_v44  ;;  %v1319_v2 = vpop.f32.mrb[10].mxu0 }
  0xfb   : > { %v1754_v0 = vadd.f32 %v1699_v62, %v770_v59  ;;  %v1343_v3 = vpop.f32.mrb[10].mxu1  ;;  %1389 = vpow2.f32 %v1235_v51  ;;  %v1238_v6 = vmul.f32 -1.442695, %v1744_v56  ;;  %723 = vst.msk [vmem:[#allocation2 + $0x40] sm:$0xff] %vm258_vm1, %v690_v60  ;;  %v693_v8 = vadd.f32 %v1319_v2, %v302_v45  ;;  %v573_v9 = vpop.f32.mrb[11].mxu0  ;;  %v303_v29 = vld [vmem:[#allocation2 + $0x60] sm:$0xff] }
  0xfc   : > { %v1254_v7 = vmul.f32 -1.442695, %v1747_v57  ;;  %v653_v10 = vpop.f32.mrb[11].mxu1  ;;  %1391 = vpow2.f32 %v1251_v52  ;;  %v1237_v11 = vmul.f32 -1.442695, %v1751_v63  ;;  %v757_v15 = vld [vmem:[#allocation2 + $0x38] sm:$0xff]  ;;  %v709_v16 = vadd.f32 %v1343_v3, %v318_v61 }
  0xfd   : > { %v1253_v14 = vmul.f32 -1.442695, %v1754_v0  ;;  %739 = vst.msk [vmem:[#allocation2 + $0xc0] sm:$0xff] %vm258_vm1, %v706_v1  ;;  %1393 = vpow2.f32 %v1238_v6  ;;  %v1764_v20 = vadd.f32 %v1699_v62, %v757_v15  ;;  %726 = vst.msk [vmem:[#allocation2 + $0x58] sm:$0xff] %vm258_vm1, %v693_v8  ;;  %v692_v21 = vadd.f32 %v573_v9, %v301_v4  ;;  %v773_v43 = vld [vmem:[#allocation2 + $0xb8] sm:$0xff]  ;;  %v756_v44 = vld [vmem:[#allocation2 + $0x30] sm:$0xff] }
  0xfe   : > { %1395 = vpow2.f32 %v1254_v7  ;;  %742 = vst.msk [vmem:[#allocation2 + $0xd8] sm:$0xff] %vm258_vm1, %v709_v16  ;;  %v708_v22 = vadd.f32 %v653_v10, %v317_v5  ;;  %v1322_v23 = vpop.f32.mrb[12].mxu0  ;;  %v772_v50 = vld [vmem:[#allocation2 + $0xb0] sm:$0xff]  ;;  %v1781_v60 = vadd.f32 %v1699_v62, %v773_v43  ;;  %v1784_v61 = vadd.f32 %v1699_v62, %v756_v44  ;;  %v319_v8 = vld [vmem:[#allocation2 + $0xe0] sm:$0xff] }
  0xff   : > { %v1346_v25 = vpop.f32.mrb[12].mxu1  ;;  %v1378_v26 = vpop.eup %1377  ;;  %1397 = vpow2.f32 %v1237_v11  ;;  %v1240_v27 = vmul.f32 -1.442695, %v1764_v20  ;;  %725 = vst.msk [vmem:[#allocation2 + $0x50] sm:$0xff] %vm258_vm1, %v692_v21  ;;  %v695_v28 = vadd.f32 %v1322_v23, %v304_v19  ;;  %v1787_v4 = vadd.f32 %v1699_v62, %v772_v50  ;;  %v321_v44 = vld [vmem:[#allocation2 + $0xf0] sm:$0xff] }
 0x100   : > { %v583_v30 = vpop.f32.mrb[13].mxu0  ;;  %v663_v31 = vpop.f32.mrb[13].mxu1  ;;  %v918_v33 = vadd.f32 1.0, %v1378_v26  ;;  %1399 = vpow2.f32 %v1253_v14  ;;  %741 = vst.msk [vmem:[#allocation2 + $0xd0] sm:$0xff] %vm258_vm1, %v708_v22  ;;  %v711_v38 = vadd.f32 %v1346_v25, %v320_v24  ;;  %v759_v55 = vld [vmem:[#allocation2 + $0x48] sm:$0xff]  ;;  %v306_v22 = vld [vmem:[#allocation2 + $0x78] sm:$0xff] }
 0x101   : > { %v1380_v32 = vpop.eup %1379  ;;  %1401 = vpow2.f32 %v1240_v27  ;;  %728 = vst.msk [vmem:[#allocation2 + $0x68] sm:$0xff] %vm258_vm1, %v695_v28  ;;  %v694_v45 = vadd.f32 %v583_v30, %v303_v29  ;;  %v775_v1 = vld [vmem:[#allocation2 + $0xc8] sm:$0xff]  ;;  %v1790_v7 = vadd.f32 %v1699_v62, %v759_v55  ;;  %v1256_v19 = vmul.f32 -1.442695, %v1781_v60  ;;  %v322_v28 = vld [vmem:[#allocation2 + $0xf8] sm:$0xff] }
 0x102   : > { %v1382_v36 = vpop.eup %1381  ;;  %v934_v37 = vadd.f32 1.0, %v1380_v32  ;;  %1403 = vrcp.f32 %v918_v33  ;;  %v1325_v46 = vpop.f32.mrb[14].mxu0  ;;  %744 = vst.msk [vmem:[#allocation2 + $0xe8] sm:$0xff] %vm258_vm1, %v711_v38  ;;  %v1793_v11 = vadd.f32 %v1699_v62, %v775_v1  ;;  %v758_v14 = vld [vmem:[#allocation2 + $0x40] sm:$0xff]  ;;  %v1239_v21 = vmul.f32 -1.442695, %v1784_v61 }
 0x103   : > { %v1384_v41 = vpop.eup %1383  ;;  %v917_v42 = vadd.f32 1.0, %v1382_v36  ;;  %v1772_v47 = vpop.f32.mrb[14].mxu1  ;;  %727 = vst.msk [vmem:[#allocation2 + $0x60] sm:$0xff] %vm258_vm1, %v694_v45  ;;  %v1255_v25 = vmul.f32 -1.442695, %v1787_v4  ;;  %v710_v27 = vadd.f32 %v663_v31, %v319_v8  ;;  %v1800_v33 = vadd.f32 %v1699_v62, %v758_v14 }
 0x104   : > { %v1386_v48 = vpop.eup %1385  ;;  %1405 = vrcp.f32 %v934_v37  ;;  %v933_v49 = vadd.f32 1.0, %v1384_v41  ;;  %v1775_v51 = vpop.f32.mrb[15].mxu0  ;;  %v774_v26 = vld [vmem:[#allocation2 + $0xc0] sm:$0xff]  ;;  %v1242_v32 = vmul.f32 -1.442695, %v1790_v7  ;;  %v761_v36 = vld [vmem:[#allocation2 + $0x58] sm:$0xff]  ;;  %v697_v43 = vadd.f32 %v1325_v46, %v306_v22 }
 0x105   : > { %v1777_v52 = vpop.f32.mrb[15].mxu1  ;;  %v1388_v53 = vpop.eup %1387  ;;  %1407 = vrcp.f32 %v917_v42  ;;  %v920_v54 = vadd.f32 1.0, %v1386_v48  ;;  %v305_v37 = vld [vmem:[#allocation2 + $0x70] sm:$0xff]  ;;  %v1258_v41 = vmul.f32 -1.442695, %v1793_v11  ;;  %v777_v42 = vld [vmem:[#allocation2 + $0xd8] sm:$0xff] }
 0x106   : > { %v1390_v58 = vpop.eup %1389  ;;  %1409 = vrcp.f32 %v933_v49  ;;  %v936_v59 = vadd.f32 1.0, %v1388_v53  ;;  %743 = vst.msk [vmem:[#allocation2 + $0xe0] sm:$0xff] %vm258_vm1, %v710_v27  ;;  %v1813_v49 = vadd.f32 %v1699_v62, %v774_v26  ;;  %v760_v50 = vld [vmem:[#allocation2 + $0x50] sm:$0xff]  ;;  %v713_v53 = vadd.f32 %v1772_v47, %v322_v28  ;;  %730 = vst.msk [vmem:[#allocation2 + $0x78] sm:$0xff] %vm258_vm1, %v697_v43 }
 0x107   : > { %v1392_v2 = vpop.eup %1391  ;;  %1411 = vrcp.f32 %v920_v54  ;;  %v919_v3 = vadd.f32 1.0, %v1390_v58  ;;  %v1818_v58 = vadd.f32 %v1699_v62, %v761_v36  ;;  %v776_v46 = vld [vmem:[#allocation2 + $0xd0] sm:$0xff]  ;;  %v1826_v47 = vadd.f32 %v1699_v62, %v777_v42 }
 0x108   : > { %v1394_v5 = vpop.eup %1393  ;;  %1413 = vrcp.f32 %v936_v59  ;;  %v935_v6 = vadd.f32 1.0, %v1392_v2  ;;  %746 = vst.msk [vmem:[#allocation2 + $0xf8] sm:$0xff] %vm258_vm1, %v713_v53  ;;  %v712_v2 = vadd.f32 %v1777_v52, %v321_v44 }
 0x109   : > { %v1396_v9 = vpop.eup %1395  ;;  %1415 = vrcp.f32 %v919_v3  ;;  %v922_v10 = vadd.f32 1.0, %v1394_v5  ;;  %v1241_v5 = vmul.f32 -1.442695, %v1800_v33 }
 0x10a   : > { %v1398_v15 = vpop.eup %1397  ;;  %1417 = vrcp.f32 %v935_v6  ;;  %v938_v16 = vadd.f32 1.0, %v1396_v9  ;;  %v779_v6 = vld [vmem:[#allocation2 + $0xe8] sm:$0xff]  ;;  %v1257_v9 = vmul.f32 -1.442695, %v1813_v49  ;;  %745 = vst.msk [vmem:[#allocation2 + $0xf0] sm:$0xff] %vm258_vm1, %v712_v2 }
 0x10b   : > { %v1400_v23 = vpop.eup %1399  ;;  %1419 = vrcp.f32 %v922_v10  ;;  %v921_v24 = vadd.f32 1.0, %v1398_v15  ;;  %v1244_v15 = vmul.f32 -1.442695, %v1818_v58  ;;  %v1858_v22 = vadd.f32 %v1699_v62, %v779_v6 }
 0x10c   : > { %v1402_v29 = vpop.eup %1401  ;;  %1421 = vrcp.f32 %v938_v16  ;;  %v937_v30 = vadd.f32 1.0, %v1400_v23 }
 0x10d   : > { %v1404_v38 = vpop.eup %1403  ;;  %1423 = vrcp.f32 %v921_v24  ;;  %v924_v31 = vadd.f32 1.0, %v1402_v29 }
 0x10e   : > { %v1406_v45 = vpop.eup %1405  ;;  %v1014_v48 = vmul.f32 %v1404_v38, %v1704_v12  ;;  %1425 = vrcp.f32 %v937_v30  ;;  %v696_v12 = vadd.f32 %v1775_v51, %v305_v37 }
 0x10f   : > { %v1408_v54 = vpop.eup %1407  ;;  %v1030_v55 = vmul.f32 %v1406_v45, %v1707_v13  ;;  %1427 = vrcp.f32 %v924_v31  ;;  %v763_v13 = vld [vmem:[#allocation2 + $0x68] sm:$0xff]  ;;  %v781_v2 = vld [vmem:[#allocation2 + $0xf8] sm:$0xff] }
 0x110   : > { %v1410_v59 = vpop.eup %1409  ;;  %1046 = vst.msk [vmem:[%s1807_s28 + $0x8] sm:$0xff] %vm258_vm1, %v1014_v48  ;;  %v1013_v1 = vmul.f32 %v1408_v54, %v1712_v17  ;;  %1429 = vpow2.f32 %v1256_v19  ;;  %v1835_v17 = vadd.f32 %v1699_v62, %v760_v50  ;;  %729 = vst.msk [vmem:[#allocation2 + $0x70] sm:$0xff] %vm258_vm1, %v696_v12  ;;  %v762_v48 = vld [vmem:[#allocation2 + $0x60] sm:$0xff]  ;;  %v765_v12 = vld [vmem:[#allocation2 + $0x78] sm:$0xff] }
 0x111   : > { %v1412_v3 = vpop.eup %1411  ;;  %1062 = vst.msk [vmem:[%s1807_s28 + $0x88] sm:$0xff] %vm258_vm1, %v1030_v55  ;;  %v1029_v51 = vmul.f32 %v1410_v59, %v1715_v18  ;;  %1431 = vpow2.f32 %v1239_v21  ;;  %v1843_v18 = vadd.f32 %v1699_v62, %v776_v46  ;;  %v1260_v21 = vmul.f32 -1.442695, %v1826_v47  ;;  %v778_v54 = vld [vmem:[#allocation2 + $0xe0] sm:$0xff] }
 0x112   : > { %v1414_v8 = vpop.eup %1413  ;;  %1045 = vst.msk [vmem:[%s1807_s28] sm:$0xff] %vm258_vm1, %v1013_v1  ;;  %v1016_v52 = vmul.f32 %v1412_v3, %v1724_v34  ;;  %1433 = vpow2.f32 %v1255_v25  ;;  %v1851_v34 = vadd.f32 %v1699_v62, %v763_v13  ;;  %v1243_v24 = vmul.f32 -1.442695, %v1835_v17 }
 0x113   : > { %v1416_v10 = vpop.eup %1415  ;;  %1061 = vst.msk [vmem:[%s1807_s28 + $0x80] sm:$0xff] %vm258_vm1, %v1029_v51  ;;  %v1032_v14 = vmul.f32 %v1414_v8, %v1727_v35  ;;  %1435 = vpow2.f32 %v1242_v32  ;;  %v1259_v26 = vmul.f32 -1.442695, %v1843_v18  ;;  %v1887_v13 = vadd.f32 %v1699_v62, %v762_v48 }
 0x114   : > { %v1418_v16 = vpop.eup %1417  ;;  %1048 = vst.msk [vmem:[%s1807_s28 + $0x18] sm:$0xff] %vm258_vm1, %v1016_v52  ;;  %v1015_v19 = vmul.f32 %v1416_v10, %v1732_v39  ;;  %1437 = vpow2.f32 %v1258_v41  ;;  %v780_v10 = vld [vmem:[#allocation2 + $0xf0] sm:$0xff] }
 0x115   : > { %v1420_v35 = vpop.eup %1419  ;;  %1064 = vst.msk [vmem:[%s1807_s28 + $0x98] sm:$0xff] %vm258_vm1, %v1032_v14  ;;  %v1031_v23 = vmul.f32 %v1418_v16, %v1735_v40  ;;  %1439 = vpow2.f32 %v1241_v5  ;;  %v1246_v40 = vmul.f32 -1.442695, %v1851_v34  ;;  %v1890_v5 = vadd.f32 %v1699_v62, %v778_v54 }
 0x116   : > { %v1422_v25 = vpop.eup %1421  ;;  %1047 = vst.msk [vmem:[%s1807_s28 + $0x10] sm:$0xff] %vm258_vm1, %v1015_v19  ;;  %v1018_v39 = vmul.f32 %v1420_v35, %v1744_v56  ;;  %1441 = vpow2.f32 %v1257_v9  ;;  %v1262_v56 = vmul.f32 -1.442695, %v1858_v22  ;;  %v1893_v9 = vadd.f32 %v1699_v62, %v765_v12 }
 0x117   : > { %v1424_v27 = vpop.eup %1423  ;;  %1063 = vst.msk [vmem:[%s1807_s28 + $0x90] sm:$0xff] %vm258_vm1, %v1031_v23  ;;  %v1034_v28 = vmul.f32 %v1422_v25, %v1747_v57  ;;  %1443 = vpow2.f32 %v1244_v15  ;;  %v764_v6 = vld [vmem:[#allocation2 + $0x70] sm:$0xff]  ;;  %v1896_v16 = vadd.f32 %v1699_v62, %v781_v2  ;;  %v1245_v35 = vmul.f32 -1.442695, %v1887_v13 }
 0x118   : > { %v1426_v29 = vpop.eup %1425  ;;  %1050 = vst.msk [vmem:[%s1807_s28 + $0x28] sm:$0xff] %vm258_vm1, %v1018_v39  ;;  %v1017_v30 = vmul.f32 %v1424_v27, %v1751_v63  ;;  %1445 = vpow2.f32 %v1260_v21  ;;  %v1900_v23 = vadd.f32 %v1699_v62, %v764_v6  ;;  %v1261_v39 = vmul.f32 -1.442695, %v1890_v5 }
 0x119   : > { %v1428_v32 = vpop.eup %1427  ;;  %1066 = vst.msk [vmem:[%s1807_s28 + $0xa8] sm:$0xff] %vm258_vm1, %v1034_v28  ;;  %v1033_v36 = vmul.f32 %v1426_v29, %v1754_v0  ;;  %1447 = vpow2.f32 %v1243_v24 }
 0x11a   : > { %v1430_v57 = vpop.eup %1429  ;;  %1049 = vst.msk [vmem:[%s1807_s28 + $0x20] sm:$0xff] %vm258_vm1, %v1017_v30  ;;  %v1020_v37 = vmul.f32 %v1428_v32, %v1764_v20  ;;  %1449 = vpow2.f32 %v1259_v26  ;;  %v1904_v26 = vadd.f32 %v1699_v62, %v780_v10 }
 0x11b   : > { %v1432_v38 = vpop.eup %1431  ;;  %1065 = vst.msk [vmem:[%s1807_s28 + $0xa0] sm:$0xff] %vm258_vm1, %v1033_v36  ;;  %v940_v63 = vadd.f32 1.0, %v1430_v57  ;;  %1451 = vpow2.f32 %v1246_v40  ;;  %v1248_v40 = vmul.f32 -1.442695, %v1893_v9 }
 0x11c   : > { %v1434_v31 = vpop.eup %1433  ;;  %1052 = vst.msk [vmem:[%s1807_s28 + $0x38] sm:$0xff] %vm258_vm1, %v1020_v37  ;;  %v923_v41 = vadd.f32 1.0, %v1432_v38  ;;  %1453 = vpow2.f32 %v1262_v56  ;;  %v1264_v56 = vmul.f32 -1.442695, %v1896_v16 }
 0x11d   : > { %v1436_v42 = vpop.eup %1435  ;;  %1455 = vrcp.f32 %v940_v63  ;;  %v939_v0 = vadd.f32 1.0, %v1434_v31 }
 0x11e   : > { %v1438_v43 = vpop.eup %1437  ;;  %1457 = vrcp.f32 %v923_v41  ;;  %v926_v44 = vadd.f32 1.0, %v1436_v42 }
 0x11f   : > { %v1440_v45 = vpop.eup %1439  ;;  %1459 = vrcp.f32 %v939_v0  ;;  %v942_v20 = vadd.f32 1.0, %v1438_v43 }
 0x120   : > { %v1442_v50 = vpop.eup %1441  ;;  %1461 = vrcp.f32 %v926_v44  ;;  %v925_v53 = vadd.f32 1.0, %v1440_v45 }
 0x121   : > { %v1444_v55 = vpop.eup %1443  ;;  %1463 = vrcp.f32 %v942_v20  ;;  %v941_v46 = vadd.f32 1.0, %v1442_v50 }
 0x122   : > { %v1446_v59 = vpop.eup %1445  ;;  %1465 = vrcp.f32 %v925_v53  ;;  %v928_v1 = vadd.f32 1.0, %v1444_v55 }
 0x123   : > { %v1448_v3 = vpop.eup %1447  ;;  %1467 = vrcp.f32 %v941_v46  ;;  %v944_v51 = vadd.f32 1.0, %v1446_v59 }
 0x124   : > { %v1450_v8 = vpop.eup %1449  ;;  %1469 = vrcp.f32 %v928_v1  ;;  %v927_v52 = vadd.f32 1.0, %v1448_v3 }
 0x125   : > { %v1452_v14 = vpop.eup %1451  ;;  %1471 = vrcp.f32 %v944_v51  ;;  %v943_v15 = vadd.f32 1.0, %v1450_v8 }
 0x126   : > { %v1454_v19 = vpop.eup %1453  ;;  %1473 = vrcp.f32 %v927_v52  ;;  %v930_v21 = vadd.f32 1.0, %v1452_v14 }
 0x127   : > { %v1456_v24 = vpop.eup %1455  ;;  %1475 = vrcp.f32 %v943_v15  ;;  %v946_v25 = vadd.f32 1.0, %v1454_v19 }
 0x128   : > { %v1458_v27 = vpop.eup %1457  ;;  %v1036_v28 = vmul.f32 %v1456_v24, %v1781_v60  ;;  %1477 = vrcp.f32 %v930_v21  ;;  %v1247_v60 = vmul.f32 -1.442695, %v1900_v23 }
 0x129   : > { %v1460_v29 = vpop.eup %1459  ;;  %v1019_v30 = vmul.f32 %v1458_v27, %v1784_v61  ;;  %1479 = vrcp.f32 %v946_v25  ;;  %v1263_v61 = vmul.f32 -1.442695, %v1904_v26 }
 0x12a   : > { %v1462_v32 = vpop.eup %1461  ;;  %1068 = vst.msk [vmem:[%s1807_s28 + $0xb8] sm:$0xff] %vm258_vm1, %v1036_v28  ;;  %v1035_v62 = vmul.f32 %v1460_v29, %v1787_v4  ;;  %1481 = vpow2.f32 %v1245_v35 }
 0x12b   : > { %v1464_v36 = vpop.eup %1463  ;;  %1051 = vst.msk [vmem:[%s1807_s28 + $0x30] sm:$0xff] %vm258_vm1, %v1019_v30  ;;  %v1022_v57 = vmul.f32 %v1462_v32, %v1790_v7  ;;  %1483 = vpow2.f32 %v1261_v39 }
 0x12c   : > { %v1466_v37 = vpop.eup %1465  ;;  %1067 = vst.msk [vmem:[%s1807_s28 + $0xb0] sm:$0xff] %vm258_vm1, %v1035_v62  ;;  %v1038_v38 = vmul.f32 %v1464_v36, %v1793_v11  ;;  %1485 = vpow2.f32 %v1248_v40 }
 0x12d   : > { %v1468_v4 = vpop.eup %1467  ;;  %1054 = vst.msk [vmem:[%s1807_s28 + $0x48] sm:$0xff] %vm258_vm1, %v1022_v57  ;;  %v1021_v63 = vmul.f32 %v1466_v37, %v1800_v33  ;;  %1487 = vpow2.f32 %v1264_v56 }
 0x12e   : > { %v1470_v7 = vpop.eup %1469  ;;  %1070 = vst.msk [vmem:[%s1807_s28 + $0xc8] sm:$0xff] %vm258_vm1, %v1038_v38  ;;  %v1037_v31 = vmul.f32 %v1468_v4, %v1813_v49  ;;  %1489 = vpow2.f32 %v1247_v60 }
 0x12f   : > { %v1472_v41 = vpop.eup %1471  ;;  %1053 = vst.msk [vmem:[%s1807_s28 + $0x40] sm:$0xff] %vm258_vm1, %v1021_v63  ;;  %v1024_v11 = vmul.f32 %v1470_v7, %v1818_v58  ;;  %1491 = vpow2.f32 %v1263_v61 }
 0x130   : > { %v1474_v42 = vpop.eup %1473  ;;  %1069 = vst.msk [vmem:[%s1807_s28 + $0xc0] sm:$0xff] %vm258_vm1, %v1037_v31  ;;  %v1040_v33 = vmul.f32 %v1472_v41, %v1826_v47 }
 0x131   : > { %v1476_v0 = vpop.eup %1475  ;;  %1056 = vst.msk [vmem:[%s1807_s28 + $0x58] sm:$0xff] %vm258_vm1, %v1024_v11  ;;  %v1023_v49 = vmul.f32 %v1474_v42, %v1835_v17 }
 0x132   : > { %v1478_v43 = vpop.eup %1477  ;;  %1072 = vst.msk [vmem:[%s1807_s28 + $0xd8] sm:$0xff] %vm258_vm1, %v1040_v33  ;;  %v1039_v44 = vmul.f32 %v1476_v0, %v1843_v18 }
 0x133   : > { %v1480_v45 = vpop.eup %1479  ;;  %1055 = vst.msk [vmem:[%s1807_s28 + $0x50] sm:$0xff] %vm258_vm1, %v1023_v49  ;;  %v1026_v58 = vmul.f32 %v1478_v43, %v1851_v34 }
 0x134   : > { %v1482_v20 = vpop.eup %1481  ;;  %1071 = vst.msk [vmem:[%s1807_s28 + $0xd0] sm:$0xff] %vm258_vm1, %v1039_v44  ;;  %v1042_v47 = vmul.f32 %v1480_v45, %v1858_v22 }
 0x135   : > { %v1484_v48 = vpop.eup %1483  ;;  %1058 = vst.msk [vmem:[%s1807_s28 + $0x68] sm:$0xff] %vm258_vm1, %v1026_v58  ;;  %v929_v50 = vadd.f32 1.0, %v1482_v20 }
 0x136   : > { %v1486_v17 = vpop.eup %1485  ;;  %1074 = vst.msk [vmem:[%s1807_s28 + $0xe8] sm:$0xff] %vm258_vm1, %v1042_v47  ;;  %v945_v53 = vadd.f32 1.0, %v1484_v48 }
 0x137   : > { %v1488_v54 = vpop.eup %1487  ;;  %1493 = vrcp.f32 %v929_v50  ;;  %v932_v18 = vadd.f32 1.0, %v1486_v17 }
 0x138   : > { %v1490_v55 = vpop.eup %1489  ;;  %1495 = vrcp.f32 %v945_v53  ;;  %v948_v34 = vadd.f32 1.0, %v1488_v54 }
 0x139   : > { %v1492_v46 = vpop.eup %1491  ;;  %1497 = vrcp.f32 %v932_v18  ;;  %v931_v12 = vadd.f32 1.0, %v1490_v55 }
 0x13a   : > { %1499 = vrcp.f32 %v948_v34  ;;  %v947_v22 = vadd.f32 1.0, %v1492_v46 }
 0x13b   : > { %1501 = vrcp.f32 %v931_v12 }
 0x13c   : > { %1503 = vrcp.f32 %v947_v22 }
 0x141   : > { %v1494_v59 = vpop.eup %1493 }
 0x142   : > { %v1496_v1 = vpop.eup %1495  ;;  %v1025_v2 = vmul.f32 %v1494_v59, %v1887_v13 }
 0x143   : > { %v1498_v3 = vpop.eup %1497  ;;  %v1041_v51 = vmul.f32 %v1496_v1, %v1890_v5 }
 0x144   : > { %v1500_v6 = vpop.eup %1499  ;;  %1057 = vst.msk [vmem:[%s1807_s28 + $0x60] sm:$0xff] %vm258_vm1, %v1025_v2  ;;  %v1028_v8 = vmul.f32 %v1498_v3, %v1893_v9 }
 0x145   : > { %v1502_v52 = vpop.eup %1501  ;;  %1073 = vst.msk [vmem:[%s1807_s28 + $0xe0] sm:$0xff] %vm258_vm1, %v1041_v51  ;;  %v1044_v10 = vmul.f32 %v1500_v6, %v1896_v16 }
 0x146   : > { %v1504_v14 = vpop.eup %1503  ;;  %1060 = vst.msk [vmem:[%s1807_s28 + $0x78] sm:$0xff] %vm258_vm1, %v1028_v8  ;;  %v1027_v15 = vmul.f32 %v1502_v52, %v1900_v23 }
 0x147   : > { %1076 = vst.msk [vmem:[%s1807_s28 + $0xf8] sm:$0xff] %vm258_vm1, %v1044_v10  ;;  %v1043_v13 = vmul.f32 %v1504_v14, %v1904_v26 }
 0x148   : > { %1059 = vst.msk [vmem:[%s1807_s28 + $0x70] sm:$0xff] %vm258_vm1, %v1027_v15 }
 0x149   : > { %1075 = vst.msk [vmem:[%s1807_s28 + $0xf0] sm:$0xff] %vm258_vm1, %v1043_v13 }
 0x14a PF: > { %s13_s14 = sadd.s32 1, %s1527_s14   ;;  %s1981_s12 = smov %s1523_s13 }
 0x14b   : > { %p10_p5 = scmp.ge.s32.totalorder %s13_s14, 4   ;;  %s1982_s13 = smov %s1984_s15 }
 0x14d   :  { %12 = sbr.rel (!%p10_p5) target bundleno = 2 (0x2), region = 76 }

</bundles_post_ra>
